<compile_context>
chip_gen: v7x
topology: tpu7x:2x2x1
jax: 0.10.0
libtpu: 0.0.40
codegen_flags: <defaults>
</compile_context>

<pallas_src>
import math

import jax
import jax.numpy as jnp
from jax import lax
from jax.experimental import pallas as pl
from jax.experimental.pallas import tpu as pltpu


def _round_up(v, m):
    return (v + m - 1) // m * m


# ----------------------------- Pallas kernel --------------------------------
def _rte_kernel(x_ref, t_ref, hi_ref, lo_ref, o_ref):
    """out = x + lin_table[t]  (vectorized one-hot gather, single store).

    x_ref  : VMEM [tile_n, Hp]  activations tile (f32 or bf16)
    t_ref  : VMEM [tile_n, 1]   int32 time indices for this tile
    hi_ref : VMEM [Lp, Hp]      bf16 high half of lin_table (resident)
    lo_ref : VMEM [Lp, Hp]      bf16 low-residual half of lin_table (resident)
    o_ref  : VMEM [tile_n, Hp]
    """
    tile_n = x_ref.shape[0]
    Lp = hi_ref.shape[0]

    t = t_ref[...]                                            # [tile_n, 1] int32
    iota = lax.broadcasted_iota(jnp.int32, (tile_n, Lp), 1)   # [tile_n, Lp]
    onehot = (iota == t).astype(jnp.bfloat16)                 # exact 0/1 in bf16

    # Exact row gather on the MXU: one nonzero product per output element,
    # accumulated in f32 (bf16*bf16 products are exact in f32).
    g = jnp.dot(onehot, hi_ref[...], preferred_element_type=jnp.float32)
    g = g + jnp.dot(onehot, lo_ref[...], preferred_element_type=jnp.float32)

    # Fused residual add; the output tile is written exactly once.
    o_ref[...] = (x_ref[...].astype(jnp.float32) + g).astype(o_ref.dtype)


# ------------------------------ host wrapper ---------------------------------
def _pick_tile_n(N, Hp):
    bytes_per_row = Hp * 4
    # >= ~512 KiB per x/out stream per grid step (amortize step overhead).
    tile = max(256, (512 * 1024) // bytes_per_row)
    # Cap so 4 double-buffered tile buffers stay <= ~16 MiB (v7x headroom).
    cap = max(64, (4 * 1024 * 1024) // bytes_per_row)
    tile = min(tile, cap, 1024)
    tile = min(tile, _round_up(max(N, 1), 8))
    return _round_up(tile, 8)


def rel_temporal_encoding(x, t, lin_table, *, tile_n=None):
    """x: [N, H] f32/bf16, t: [N] int, lin_table: [L, H] f32 (= emb @ W^T + b)."""
    N, H = x.shape
    L, _ = lin_table.shape

    Hp = _round_up(H, 128)          # lane-dense hidden dim
    Lp = _round_up(L, 256)          # 256-aligned contraction dim for the MXU

    if tile_n is None:
        tile_n = _pick_tile_n(N, Hp)
    tile_n = _round_up(min(tile_n, _round_up(max(N, 1), 8)), 8)

    # Clamp indices: Pallas does not bounds-check VMEM refs.
    t_i = jnp.clip(t.astype(jnp.int32), 0, L - 1)

    aligned = (H == Hp) and (N % tile_n == 0) and N > 0
    if aligned:
        # Fast path: no pad / no slice -> minimal HBM traffic.
        Np = N
        x_in = x
        t_in = t_i[:, None]
    else:
        Np = _round_up(max(N, 1), tile_n)
        x_in = jnp.zeros((Np, Hp), x.dtype).at[:N, :H].set(x)
        t_in = jnp.zeros((Np, 1), jnp.int32).at[:N, 0].set(t_i)

    # Pad the tiny table and split it into bf16 hi/lo halves (exact gather,
    # half the resident VMEM of an f32 table).
    if (L, H) == (Lp, Hp):
        tbl = lin_table.astype(jnp.float32)
    else:
        tbl = jnp.zeros((Lp, Hp), jnp.float32).at[:L, :H].set(
            lin_table.astype(jnp.float32))
    tbl_hi = tbl.astype(jnp.bfloat16)
    tbl_lo = (tbl - tbl_hi.astype(jnp.float32)).astype(jnp.bfloat16)

    grid = (Np // tile_n,)
    out = pl.pallas_call(
        _rte_kernel,
        out_shape=jax.ShapeDtypeStruct((Np, Hp), x.dtype),
        grid_spec=pltpu.PrefetchScalarGridSpec(
            num_scalar_prefetch=0,
            grid=grid,
            in_specs=[
                pl.BlockSpec((tile_n, Hp), lambda i: (i, 0)),   # x tile
                pl.BlockSpec((tile_n, 1), lambda i: (i, 0)),    # t tile (int32)
                pl.BlockSpec((Lp, Hp), lambda i: (0, 0)),       # table hi (resident)
                pl.BlockSpec((Lp, Hp), lambda i: (0, 0)),       # table lo (resident)
            ],
            out_specs=pl.BlockSpec((tile_n, Hp), lambda i: (i, 0)),
        ),
        compiler_params=pltpu.CompilerParams(
            # Independent row tiles -> megacore-shardable on v7x; neutral on
            # the single-TC v5e/v6e.
            dimension_semantics=("parallel",),
        ),
    )(x_in, t_in, tbl_hi, tbl_lo)

    return out if aligned else out[:N, :H]


# ------------------------- parameter construction ---------------------------
def make_params(n_hid, max_len=240, key=None):
    # Frozen sinusoid embedding table, exactly as in the PyTorch __init__.
    position = jnp.arange(0.0, max_len, dtype=jnp.float32)[:, None]            # [L,1]
    div_term = jnp.exp(
        jnp.arange(0, n_hid, 2, dtype=jnp.float32) * -(math.log(10000.0) / n_hid)
    )                                                                           # [ceil(H/2)]
    emb = jnp.zeros((max_len, n_hid), jnp.float32)
    emb = emb.at[:, 0::2].set(jnp.sin(position * div_term) / math.sqrt(n_hid))
    emb = emb.at[:, 1::2].set(
        jnp.cos(position * div_term[: n_hid // 2]) / math.sqrt(n_hid))          # odd-H safe

    # nn.Linear(n_hid, n_hid): uniform(-1/sqrt(H), 1/sqrt(H)).
    kw, kb = jax.random.split(key)
    bound = 1.0 / math.sqrt(n_hid)
    w = jax.random.uniform(kw, (n_hid, n_hid), jnp.float32, -bound, bound)      # [out,in]
    b = jax.random.uniform(kb, (n_hid,), jnp.float32, -bound, bound)            # [out]
    return emb, w, b


def precompute_lin_table(emb_table, w, b):
    # One-time per weight update: fold the Linear into the frozen table so the
    # hot path has no per-row matmul at all.
    return (
        jnp.dot(emb_table, w.T, precision=jax.lax.Precision.HIGHEST) + b[None, :]
    )


# ----------------------------------- main ------------------------------------
if __name__ == "__main__":
    # TODO(synk): dropout declared in the PyTorch __init__ is never used in
    # forward(), so it is intentionally omitted.

    # Lane-dense demo hitting the aligned fast path with a 2-step parallel grid.
    N, n_hid, max_len = 256, 128, 240

    key = jax.random.PRNGKey(0)
    k_emb, k_x, k_t = jax.random.split(key, 3)

    emb_table, w, b = make_params(n_hid, max_len, key=k_emb)
    x = jax.random.normal(k_x, (N, n_hid), jnp.float32)
    t = jax.random.randint(k_t, (N,), 0, max_len, jnp.int32)

    lin_table = precompute_lin_table(emb_table, w, b)           # [max_len, H]

    out = rel_temporal_encoding(x, t, lin_table, tile_n=128)
    out = jax.block_until_ready(out)

    # Pure-JAX reference of the original forward semantics.
    ref = x + (
        jnp.dot(emb_table[t], w.T, precision=jax.lax.Precision.HIGHEST) + b
    )
    assert out.shape == (N, n_hid) and out.dtype == jnp.float32
    assert jnp.allclose(out, ref, atol=1e-5, rtol=1e-5)

    # Ragged / non-lane-dense shapes exercise the padded fallback (N=13, H=32).
    N2, H2 = 13, 32
    emb2, w2, b2 = make_params(H2, max_len, key=k_emb)
    x2 = jax.random.normal(k_x, (N2, H2), jnp.float32)
    t2 = jax.random.randint(k_t, (N2,), 0, max_len, jnp.int32)
    out2 = jax.block_until_ready(
        rel_temporal_encoding(x2, t2, precompute_lin_table(emb2, w2, b2))
    )
    ref2 = x2 + (
        jnp.dot(emb2[t2], w2.T, precision=jax.lax.Precision.HIGHEST) + b2
    )
    assert out2.shape == (N2, H2)
    assert jnp.allclose(out2, ref2, atol=1e-5, rtol=1e-5)

    print("KERNEL_OK")
</pallas_src>

<mosaic_0001>
module attributes {stable_mosaic.version = 11 : i64} {
  func.func @_rte_kernel(%arg0: i32, %arg1: memref<128x128xf32, #tpu.memory_space<vmem>>, %arg2: memref<128x1xi32, #tpu.memory_space<vmem>>, %arg3: memref<256x128xbf16, #tpu.memory_space<vmem>>, %arg4: memref<256x128xbf16, #tpu.memory_space<vmem>>, %arg5: memref<128x128xf32, #tpu.memory_space<vmem>>) attributes {dimension_semantics = [#tpu.dimension_semantics<parallel>], iteration_bounds = array<i64: 2>, scalar_prefetch = 0 : i64, scratch_operands = 0 : i64, tpu.core_type = #tpu.core_type<tc>, window_params = [{transform_indices = @transform_0, window_bounds = array<i64: 128, 128>}, {transform_indices = @transform_1, window_bounds = array<i64: 128, 1>}, {pipeline_mode = #tpu.pipeline_mode<synchronous>, transform_indices = @transform_2, window_bounds = array<i64: 256, 128>}, {pipeline_mode = #tpu.pipeline_mode<synchronous>, transform_indices = @transform_3, window_bounds = array<i64: 256, 128>}, {transform_indices = @transform_4, window_bounds = array<i64: 128, 128>}]} {
    %c0 = arith.constant 0 : index
    %c0_0 = arith.constant 0 : index
    %0 = vector.load %arg2[%c0, %c0_0] : memref<128x1xi32, #tpu.memory_space<vmem>>, vector<128x1xi32>
    %1 = tpu.iota {dimensions = array<i32: 1>} : vector<128x256xi32>
    %2 = vector.broadcast %0 : vector<128x1xi32> to vector<128x256xi32>
    %3 = arith.cmpi eq, %1, %2 : vector<128x256xi32>
    %4 = arith.extui %3 : vector<128x256xi1> to vector<128x256xi32>
    %5 = arith.sitofp %4 : vector<128x256xi32> to vector<128x256xf32>
    %6 = arith.truncf %5 : vector<128x256xf32> to vector<128x256xbf16>
    %c0_1 = arith.constant 0 : index
    %c0_2 = arith.constant 0 : index
    %7 = vector.load %arg3[%c0_1, %c0_2] : memref<256x128xbf16, #tpu.memory_space<vmem>>, vector<256x128xbf16>
    %cst = arith.constant dense<0.000000e+00> : vector<128x128xf32>
    %8 = tpu.matmul %6, %7, %cst {dimension_numbers = #tpu.dot_dimension_numbers<[1], [0], [0], [1], [0, 0, 1, 1], [], []>} : vector<128x256xbf16>, vector<256x128xbf16>, vector<128x128xf32> -> vector<128x128xf32>
    %c0_3 = arith.constant 0 : index
    %c0_4 = arith.constant 0 : index
    %9 = vector.load %arg4[%c0_3, %c0_4] : memref<256x128xbf16, #tpu.memory_space<vmem>>, vector<256x128xbf16>
    %cst_5 = arith.constant dense<0.000000e+00> : vector<128x128xf32>
    %10 = tpu.matmul %6, %9, %cst_5 {dimension_numbers = #tpu.dot_dimension_numbers<[1], [0], [0], [1], [0, 0, 1, 1], [], []>} : vector<128x256xbf16>, vector<256x128xbf16>, vector<128x128xf32> -> vector<128x128xf32>
    %11 = arith.addf %8, %10 : vector<128x128xf32>
    %c0_6 = arith.constant 0 : index
    %c0_7 = arith.constant 0 : index
    %12 = vector.load %arg1[%c0_6, %c0_7] : memref<128x128xf32, #tpu.memory_space<vmem>>, vector<128x128xf32>
    %13 = arith.addf %12, %11 : vector<128x128xf32>
    %c0_8 = arith.constant 0 : index
    %c0_9 = arith.constant 0 : index
    %14 = vector.load %arg5[%c0_8, %c0_9] : memref<128x128xf32, #tpu.memory_space<vmem>>, vector<128x128xf32>
    tpu.vector_store %arg5[%c0_8, %c0_9], %13 {strides = array<i32>} : memref<128x128xf32, #tpu.memory_space<vmem>>, vector<128x128xf32>,
    return
  }
  func.func @transform_0(%arg0: i32) -> (i32, i32) {
    %c0_i32 = arith.constant 0 : i32
    %c0_i32_0 = arith.constant 0 : i32
    return %arg0, %c0_i32 : i32, i32
  }
  func.func @transform_1(%arg0: i32) -> (i32, i32) {
    %c0_i32 = arith.constant 0 : i32
    %c0_i32_0 = arith.constant 0 : i32
    return %arg0, %c0_i32 : i32, i32
  }
  func.func @transform_2(%arg0: i32) -> (i32, i32) {
    %c0_i32 = arith.constant 0 : i32
    %c0_i32_0 = arith.constant 0 : i32
    %c0_i32_1 = arith.constant 0 : i32
    return %c0_i32, %c0_i32_0 : i32, i32
  }
  func.func @transform_3(%arg0: i32) -> (i32, i32) {
    %c0_i32 = arith.constant 0 : i32
    %c0_i32_0 = arith.constant 0 : i32
    %c0_i32_1 = arith.constant 0 : i32
    return %c0_i32, %c0_i32_0 : i32, i32
  }
  func.func @transform_4(%arg0: i32) -> (i32, i32) {
    %c0_i32 = arith.constant 0 : i32
    %c0_i32_0 = arith.constant 0 : i32
    return %arg0, %c0_i32 : i32, i32
  }
}

</mosaic_0001>

<bundles_post_ra>
// kernel: tpu_custom_call.1
= control target key start
LH: loop header
LB: loop body
LE: loop exit
PB: predicated region body
PF: predicated region fallthrough
CT: control target
= control target key end

     0   :  { %9 = vsyncpa [#allocation3], 0  ;;  %s1888_s0 = inlined_call_operand.vmem [shape: f32[256,128], index: 0, kind: input, shape index: {}]   ;;  %s1889_s1 = inlined_call_operand.vmem [shape: s32[256,1], index: 1, kind: input, shape index: {}]   ;;  %s1890_s2 = inlined_call_operand.hbm [shape: bf16[256,128], index: 2, kind: input, shape index: {}]   ;;  %s1891_s3 = inlined_call_operand.hbm [shape: bf16[256,128], index: 3, kind: input, shape index: {}]   ;;  %s1892_s4 = inlined_call_operand.hbm [shape: f32[256,128], index: 4, kind: output, shape index: {}]  }
   0x1   :  { %10 = vsyncpa [#allocation6], 0 }
   0x2   :  { %11 = vsyncpa [#allocation4], 0 }
   0x3   :  { %13 = vsyncpa [#allocation4 + $0x1], 0  ;;  %s1576_s15 = smov 0   ;;  %s1578_s16 = smov 0  }
   0x4   :  { %s1580_s17 = smov 0   ;;  %s1582_s18 = smov 0  }
   0x5 LB: > { %s1597_s19 = sadd.s32 4294967295, %s1540_s18   ;;  %s1039_s20 = sadd.s32 4294967294, %s1540_s18   ;;  %s1540_s18 = sphi %s1582_s18, %s1910_s18   ;;  %s1536_s17 = sphi %s1580_s17, %s1909_s17   ;;  %s1532_s16 = sphi %s1578_s16, %s1908_s16   ;;  %s1528_s15 = sphi %s1576_s15, %s1907_s15  }
   0x6   : > { %s1601_s21 = sadd.s32 1, %s1540_s18   ;;  %s120_s22 = sadd.s32 1, %s1536_s17 }
   0x7   : > { %s117_s23 = ssub.s32 %s1540_s18, %s1601_s21  ;;  %p130_p0 = scmp.ne.s32.totalorder %s1536_s17, %s1532_s16 }
   0x8   : > { %p118_p1 = scmp.eq.s32.totalorder %s117_s23, 0  ;;  %p131_p2 = scmp.eq.s32.totalorder %s1597_s19, 1 }
   0x9   : > { %p136_p3 = scmp.ne.s32.totalorder %s1532_s16, %s1528_s15  ;;  %p137_p4 = scmp.eq.s32.totalorder %s1039_s20, 1 }
   0xa   : > { %s1612_s24 = scalar_select %p118_p1, %s1536_s17, %s120_s22  }
   0xb   : > { %p1614_p5 = por %p131_p2, %p130_p0  ;;  %p1618_p6 = por %p137_p4, %p136_p3 }
   0xc   : > { %p1040_p7 = scmp.ge.s32.totalorder %s1540_s18, 1  ;;  %p144_p8 = scmp.lt.s32.totalorder %s1540_s18, 3 }
   0xd   : > { %s1896_s25 = scalar_select %p1614_p5, 1, 0 }
   0xe   : > { %s1897_s26 = scalar_select %p1618_p6, 1, 0 }
   0xf   : > { %p1893_p9 = scmp.eq.s32.totalorder %s1597_s19, 0  ;;  %p1625_p10 = pnand %p1040_p7, %p144_p8 }
  0x10   : > { %s1542_s28 = smov [#allocation2]   ;;  %s1543_s5 = smov [#allocation5]  }
  0x11   : > { %s1898_s27 = scalar_select %p1625_p10, 1, 0 }
  0x12   : > { %s156_s29 = sshll.u32 %s1542_s28, 4  ;;  %p1324_p11 = pneg %p1625_p10  ;;  %s157_s29 = int_to_ptr.vmem [resolvable:$true] %s156_s29 }
  0x13   : > { %s169_s6 = sshll.u32 %s1543_s5, 4  ;;  %s1414_s9 = scalar_lea.hbm %s1890_s2, 2048  ;;  %s1637_s6 = int_to_ptr.vmem [resolvable:$true] %s169_s6 }
  0x14   : > { %p1633_p12 = pnand %p1893_p9, %p1324_p11  ;;  %p1415_p13 = scmp.ne.s32.totalorder %s1890_s2, %s1414_s9 }
  0x15   : > { %p1421_p3 = scmp.lt.u32.totalorder %s1414_s9, %s1890_s2 }
  0x16   : > { %p1416_p0 = pneg %p1633_p12 }
  0x18   : > { %p1417_p1 = pnand %p1416_p0, %p1415_p13 }
  0x1a   : > { %p1418_p2 = pneg %p1417_p1 }
  0x1c   : > { %p1423_p4 = pnand %p1421_p3, %p1418_p2 }
  0x1e   : > { %1426 = shalt.err (!%p1423_p4)
}
  0x1f   : > { %s1427_s14 = scalar_lea.vmem %s157_s29, 2048  ;;  %p1435_p9 = scmp.lt.s32.totalorder %s157_s29, %s157_s29 }
  0x20   : > { %p1428_p7 = scmp.ne.s32.totalorder %s157_s29, %s1427_s14  ;;  %p1436_p6 = scmp.lt.s32.totalorder %s1427_s14, %s1427_s14 }
  0x22   : > { %p1430_p8 = pnand %p1428_p7, %p1416_p0  ;;  %p1437_p5 = por %p1436_p6, %p1435_p9 }
  0x24   : > { %p1431_p11 = pneg %p1430_p8 }
  0x26   : > { %p1438_p10 = pnand %p1437_p5, %p1431_p11 }
  0x28   : > { %1441 = shalt.err (!%p1438_p10)
}
  0x29   : > { %s1544_s20 = smov 64   ;;  %s1545_s22 = smov 4  }
  0x2a   : > { %1327 = dma.hbm_to_vmem [thread:$0]  (!%p1633_p12), %s1890_s2, 2048, %s157_s29, [#allocation3], %s1544_s20, %s1544_s20, %s1545_s22  }
  0x2b   : > { %s1442_s8 = scalar_lea.hbm %s1891_s3, 2048 }
  0x2c   : > { %p1443_p13 = scmp.ne.s32.totalorder %s1891_s3, %s1442_s8  ;;  %p1449_p9 = scmp.lt.u32.totalorder %s1442_s8, %s1891_s3 }
  0x2e   : > { %p1445_p5 = pnand %p1443_p13, %p1416_p0 }
  0x30   : > { %p1446_p6 = pneg %p1445_p5 }
  0x32   : > { %p1451_p10 = pnand %p1449_p9, %p1446_p6 }
  0x34   : > { %1454 = shalt.err (!%p1451_p10)
}
  0x35   : > { %s1455_s29 = scalar_lea.vmem %s1637_s6, 2048  ;;  %p1463_p4 = scmp.lt.s32.totalorder %s1637_s6, %s1637_s6 }
  0x36   : > { %p1456_p1 = scmp.ne.s32.totalorder %s1637_s6, %s1455_s29  ;;  %p1464_p7 = scmp.lt.s32.totalorder %s1455_s29, %s1455_s29 }
  0x38   : > { %p1458_p2 = pnand %p1456_p1, %p1416_p0  ;;  %p1465_p8 = por %p1464_p7, %p1463_p4 }
  0x3a   : > { %p1459_p3 = pneg %p1458_p2 }
  0x3c   : > { %p1466_p11 = pnand %p1465_p8, %p1459_p3 }
  0x3e   : > { %1469 = shalt.err (!%p1466_p11)
}
  0x3f   : > { %1330 = dma.hbm_to_vmem [thread:$0]  (!%p1633_p12), %s1891_s3, 2048, %s1637_s6, [#allocation6], %s1544_s20, %s1544_s20, %s1545_s22  }
  0x40   : > { %p1900_p13 = scmp.ne.s32.totalorder %s1898_s27, 0 }
  0x41   : > { %p1901_p5 = scmp.eq.s32.totalorder (!%p1900_p13), %s1597_s19, 0 }
  0x42   : > { %203 = sbr.rel (%p1900_p13) target bundleno = 514 (0x202), region = 36 }
  0x49   : > { %1515 = dma.done.wait (%p1901_p5), [#allocation3], 2048   ;;  %p1902_p0 = pmov %p1901_p5 }
  0x4b   : > { %1517 = vsyncadd (%p1902_p0), [#allocation3], 4294965248  ;;  %p1903_p6 = pmov %p1902_p0 }
  0x4c   : > { %p1904_p9 = pmov %p1902_p0 }
  0x4d   : > { %1519 = dma.done.wait (%p1903_p6), [#allocation6], 2048  }
  0x4e   : > { %1521 = vsyncadd (%p1904_p9), [#allocation6], 4294965248  ;;  %s1048_s30 = sshll.u32 %s1597_s19, 4  ;;  %v1546_v0 = vmov 0   ;;  %v1382_v7 = vld [vmem:[#allocation5 + $0x40] sm:$0xff]   ;;  %v1386_v13 = vld [vmem:[#allocation5 + $0x48] sm:$0xff]   ;;  %v268_v49 = vlaneseq }
  0x4f   : > { %1381 = vset.pattern.permute.xlu1 %v1546_v0  ;;  %1380 = vset.pattern.permute.xlu0 %v1546_v0  ;;  %p239_p12 = scmp.lt.s32.totalorder %s1048_s30, 31  ;;  %v1383_v8 = vld [vmem:[#allocation2 + $0x40] sm:$0xff]   ;;  %v1387_v14 = vld [vmem:[#allocation2 + $0x48] sm:$0xff]   ;;  %v1390_v19 = vld [vmem:[#allocation5 + $0x50] sm:$0xff]   ;;  %v1547_v56 = vmov 1.0|1.0  }
  0x50   : > { %1186 = vmatprep.subr.bf16.mxu0 %v1382_v7  ;;  %v1384_v11 = vld [vmem:[#allocation5] sm:$0xff]   ;;  %1250 = vmatprep.subr.bf16.mxu1 %v1383_v8  ;;  %v1388_v17 = vld [vmem:[#allocation5 + $0x8] sm:$0xff]   ;;  %v1391_v20 = vld [vmem:[#allocation2 + $0x50] sm:$0xff]   ;;  %v1723_v50 = vand.u32 127, %v268_v49  ;;  %s235_s23 = sand.u32 1, %s1532_s16   ;;  %s1185_s10 = sshll.u32 %s1597_s19, 11 }
  0x51   : > { %s1912_s30 = smov (!%p239_p12, %s1048_s30), 31  ;;  %v1385_v12 = vld [vmem:[#allocation2] sm:$0xff]   ;;  %1187 = vmatpush3.bf16.msra.mxu0 %v1384_v11  ;;  %v1389_v18 = vld [vmem:[#allocation2 + $0x8] sm:$0xff]   ;;  %v1392_v23 = vld [vmem:[#allocation5 + $0x10] sm:$0xff]   ;;  %s1047_s8 = sshll.u32 %s235_s23, 7 }
  0x52   : > { %s1049_s27 = sshll.u32 %s1912_s30, 3  ;;  %1251 = vmatpush3.bf16.msra.mxu1 %v1385_v12  ;;  %1188 = vmatprep.subr.bf16.mxu0 %v1386_v13  ;;  %v1393_v24 = vld [vmem:[#allocation2 + $0x10] sm:$0xff]   ;;  %v1394_v25 = vld [vmem:[#allocation5 + $0x58] sm:$0xff]   ;;  %v1398_v31 = vld [vmem:[#allocation5 + $0x60] sm:$0xff]   ;;  %v1726_v53 = vadd.s32 128, %v1723_v50  ;;  %s1804_s9 = scalar_lea.vmem [#allocation7], %s1047_s8 }
  0x53   : > { %s1705_s22 = scalar_lea.vmem %s1889_s1, %s1049_s27  ;;  %1252 = vmatprep.subr.bf16.mxu1 %v1387_v14  ;;  %v1395_v26 = vld [vmem:[#allocation2 + $0x58] sm:$0xff]   ;;  %v1399_v32 = vld [vmem:[#allocation2 + $0x60] sm:$0xff]   ;;  %v1402_v37 = vld [vmem:[#allocation5 + $0x68] sm:$0xff]   ;;  %s1798_s7 = scalar_lea.vmem %s1888_s0, %s1049_s27 }
  0x54   : > { %v254_v1 = vld [vmem:[%s1705_s22 + $0x10] sm:$0xff]  ;;  %v252_v2 = vld [vmem:[%s1705_s22] sm:$0xff]  ;;  %v255_v3 = vld [vmem:[%s1705_s22 + $0x18] sm:$0xff]  ;;  %s943_s11 = sshll.u32 %s1804_s9, 4  ;;  %s1839_s13 = scalar_lea.hbm %s1892_s4, %s1185_s10  ;;  %s1841_s11 = int_to_ptr.vmem [resolvable:$true] %s943_s11 }
  0x55   : > { %278 = vperm.xlu1 %1381, %v254_v1   ;;  %272 = vperm.xlu0 %1380, %v252_v2   ;;  %v253_v4 = vld [vmem:[%s1705_s22 + $0x8] sm:$0xff]  ;;  %v256_v6 = vld [vmem:[%s1705_s22 + $0x20] sm:$0xff]  ;;  %v259_v9 = vld [vmem:[%s1705_s22 + $0x38] sm:$0xff]  ;;  %s1847_s14 = scalar_lea.sflag [#allocation4], %s235_s23  ;;  %s1470_s19 = scalar_lea.vmem %s1841_s11, 2048 }
  0x56   : > { %v257_v5 = vld [vmem:[%s1705_s22 + $0x28] sm:$0xff]  ;;  %v258_v10 = vld [vmem:[%s1705_s22 + $0x30] sm:$0xff]  ;;  %v260_v16 = vld [vmem:[%s1705_s22 + $0x40] sm:$0xff]  ;;  %1189 = vmatpush3.bf16.msra.mxu0 %v1388_v17  ;;  %1253 = vmatpush3.bf16.msra.mxu1 %v1389_v18  ;;  %p1471_p10 = scmp.ne.s32.totalorder %s1841_s11, %s1470_s19  ;;  %p1905_p1 = scmp.ne.s32.totalorder %s1896_s25, 0 }
  0x57   : > { %v261_v15 = vld [vmem:[%s1705_s22 + $0x48] sm:$0xff]  ;;  %v263_v21 = vld [vmem:[%s1705_s22 + $0x58] sm:$0xff]  ;;  %v262_v22 = vld [vmem:[%s1705_s22 + $0x50] sm:$0xff]  ;;  %1190 = vmatprep.subr.bf16.mxu0 %v1390_v19  ;;  %1254 = vmatprep.subr.bf16.mxu1 %v1391_v20  ;;  %s1548_s30 = smov [#allocation7]  }
  0x58   : > { %v265_v27 = vld [vmem:[%s1705_s22 + $0x68] sm:$0xff]  ;;  %v264_v28 = vld [vmem:[%s1705_s22 + $0x60] sm:$0xff]  ;;  %v1396_v29 = vld [vmem:[#allocation5 + $0x18] sm:$0xff]   ;;  %p1472_p2 = pnand %p1471_p10, %p1905_p1  ;;  %s1474_s27 = sshll.u32 %s1548_s30, 4  ;;  %s1475_s27 = int_to_ptr.vmem [resolvable:$false] %s1474_s27 }
  0x59   : > { %281 = vperm.xlu1 %1381, %v255_v3   ;;  %275 = vperm.xlu0 %1380, %v253_v4   ;;  %v1397_v30 = vld [vmem:[#allocation2 + $0x18] sm:$0xff]   ;;  %v266_v34 = vld [vmem:[%s1705_s22 + $0x70] sm:$0xff]  ;;  %v1400_v35 = vld [vmem:[#allocation5 + $0x20] sm:$0xff]   ;;  %s1476_s6 = scalar_lea.vmem %s1475_s27, 4096  ;;  %p1477_p4 = scmp.lt.s32.totalorder %s1841_s11, %s1475_s27 }
  0x5a   : > { %1191 = vmatpush3.bf16.msra.mxu0 %v1392_v23  ;;  %1255 = vmatpush3.bf16.msra.mxu1 %v1393_v24  ;;  %v267_v33 = vld [vmem:[%s1705_s22 + $0x78] sm:$0xff]  ;;  %v1401_v36 = vld [vmem:[#allocation2 + $0x20] sm:$0xff]   ;;  %v1403_v38 = vld [vmem:[#allocation2 + $0x68] sm:$0xff]   ;;  %p1473_p3 = pneg %p1472_p2  ;;  %p1478_p7 = scmp.lt.s32.totalorder %s1476_s6, %s1470_s19 }
  0x5b   : > { %1192 = vmatprep.subr.bf16.mxu0 %v1394_v25  ;;  %1256 = vmatprep.subr.bf16.mxu1 %v1395_v26  ;;  %v1404_v39 = vld [vmem:[#allocation5 + $0x28] sm:$0xff]   ;;  %v1406_v41 = vld [vmem:[#allocation5 + $0x70] sm:$0xff]   ;;  %v1410_v45 = vld [vmem:[#allocation5 + $0x78] sm:$0xff]  }
  0x5c   : > { %v1405_v40 = vld [vmem:[#allocation2 + $0x28] sm:$0xff]   ;;  %v1407_v42 = vld [vmem:[#allocation2 + $0x70] sm:$0xff]   ;;  %v1411_v46 = vld [vmem:[#allocation2 + $0x78] sm:$0xff]   ;;  %p1479_p8 = por %p1478_p7, %p1477_p4 }
  0x5d   : > { %287 = vperm.xlu1 %1381, %v257_v5   ;;  %284 = vperm.xlu0 %1380, %v256_v6   ;;  %v1408_v43 = vld [vmem:[#allocation5 + $0x30] sm:$0xff]   ;;  %v1412_v47 = vld [vmem:[#allocation5 + $0x38] sm:$0xff]   ;;  %v881_v13 = vld [vmem:[%s1798_s7] sm:$0xff] }
  0x5e   : > { %1193 = vmatpush3.bf16.msra.mxu0 %v1396_v29  ;;  %1257 = vmatpush3.bf16.msra.mxu1 %v1397_v30  ;;  %v1409_v44 = vld [vmem:[#allocation2 + $0x30] sm:$0xff]   ;;  %v1413_v48 = vld [vmem:[#allocation2 + $0x38] sm:$0xff]   ;;  %v882_v19 = vld [vmem:[%s1798_s7 + $0x8] sm:$0xff]  ;;  %p1480_p11 = pnand %p1479_p8, %p1473_p3 }
  0x5f   : > { %1194 = vmatprep.subr.bf16.mxu0 %v1398_v31  ;;  %1258 = vmatprep.subr.bf16.mxu1 %v1399_v32  ;;  %v883_v31 = vld [vmem:[%s1798_s7 + $0x10] sm:$0xff]  ;;  %v885_v49 = vld [vmem:[%s1798_s7 + $0x20] sm:$0xff] }
  0x61   : > { %293 = vperm.xlu1 %1381, %v259_v9   ;;  %290 = vperm.xlu0 %1380, %v258_v10  }
  0x62   : > { %1195 = vmatpush3.bf16.msra.mxu0 %v1400_v35  ;;  %1259 = vmatpush3.bf16.msra.mxu1 %v1401_v36 }
  0x63   : > { %1196 = vmatprep.subr.bf16.mxu0 %v1402_v37  ;;  %1260 = vmatprep.subr.bf16.mxu1 %v1403_v38  ;;  %v884_v37 = vld [vmem:[%s1798_s7 + $0x18] sm:$0xff] }
  0x65   : > { %299 = vperm.xlu1 %1381, %v261_v15   ;;  %296 = vperm.xlu0 %1380, %v260_v16  }
  0x66   : > { %1197 = vmatpush3.bf16.msra.mxu0 %v1404_v39  ;;  %1261 = vmatpush3.bf16.msra.mxu1 %v1405_v40 }
  0x67   : > { %1198 = vmatprep.subr.bf16.mxu0 %v1406_v41  ;;  %1262 = vmatprep.subr.bf16.mxu1 %v1407_v42 }
  0x69   : > { %305 = vperm.xlu1 %1381, %v263_v21   ;;  %302 = vperm.xlu0 %1380, %v262_v22  }
  0x6a   : > { %1199 = vmatpush3.bf16.msra.mxu0 %v1408_v43  ;;  %1263 = vmatpush3.bf16.msra.mxu1 %v1409_v44 }
  0x6b   : > { %1200 = vmatprep.subr.bf16.mxu0 %v1410_v45  ;;  %1264 = vmatprep.subr.bf16.mxu1 %v1411_v46 }
  0x6d   : > { %311 = vperm.xlu1 %1381, %v265_v27   ;;  %308 = vperm.xlu0 %1380, %v264_v28  }
  0x6e   : > { %1201 = vmatpush3.bf16.msra.mxu0 %v1412_v47  ;;  %1265 = vmatpush3.bf16.msra.mxu1 %v1413_v48 }
  0x71   : > { %317 = vperm.xlu1 %1381, %v267_v33   ;;  %314 = vperm.xlu0 %1380, %v266_v34  }
  0xd4   : > { %v279_v51 = vpop.permute.xlu1 %278  ;;  %v273_v52 = vpop.permute.xlu0 %272 }
  0xd5   : > { %vm324_vm0 = vcmp.eq.s32.totalorder %v1726_v53, %v279_v51  ;;  %vm319_vm4 = vcmp.eq.s32.totalorder %v1723_v50, %v273_v52  ;;  %vm320_vm7 = vcmp.eq.s32.totalorder %v1726_v53, %v273_v52  ;;  %vm323_vm9 = vcmp.eq.s32.totalorder %v1723_v50, %v279_v51 }
  0xd8   : > { %v282_v54 = vpop.permute.xlu1 %281  ;;  %v276_v55 = vpop.permute.xlu0 %275 }
  0xd9   : > { %vm326_vm1 = vcmp.eq.s32.totalorder %v1726_v53, %v282_v54  ;;  %vm321_vm2 = vcmp.eq.s32.totalorder %v1723_v50, %v276_v55  ;;  %vm322_vm3 = vcmp.eq.s32.totalorder %v1726_v53, %v276_v55  ;;  %vm325_vm10 = vcmp.eq.s32.totalorder %v1723_v50, %v282_v54  ;;  %v886_v55 = vld [vmem:[%s1798_s7 + $0x28] sm:$0xff] }
  0xda   : > { %vm1104_vm5 = vmpackc.low %vm326_vm1, %vm324_vm0 }
  0xdb   : > { %vm1102_vm6 = vmpackc.low %vm321_vm2, %vm319_vm4 }
  0xdc   : > { %vm1100_vm8 = vmpackc.low %vm322_vm3, %vm320_vm7  ;;  %v288_v57 = vpop.permute.xlu1 %287  ;;  %v285_v58 = vpop.permute.xlu0 %284 }
  0xdd   : > { %1101 = vmatprep.mubr.msk.bf16.mxu0 %vm1100_vm8, %v1547_v56  ;;  %1149 = vmatprep.mubr.msk.bf16.mxu1 %vm1100_vm8, %v1547_v56  ;;  %vm330_vm11 = vcmp.eq.s32.totalorder %v1726_v53, %v288_v57  ;;  %vm328_vm12 = vcmp.eq.s32.totalorder %v1726_v53, %v285_v58  ;;  %vm1106_vm13 = vmpackc.low %vm325_vm10, %vm323_vm9  ;;  %vm329_vm15 = vcmp.eq.s32.totalorder %v1723_v50, %v288_v57 }
  0xde   : > { %1103 = vmatmul.mubr.msk.bf16.vlgmr.msra.gmra.mrb[0].mxu0 %vm1102_vm6, %v1547_v56  ;;  %1151 = vmatmul.mubr.msk.bf16.vlgmr.msra.gmra.mrb[0].mxu1 %vm1102_vm6, %v1547_v56  ;;  %vm1108_vm14 = vmpackc.low %vm330_vm11, %vm328_vm12  ;;  %vm327_vm0 = vcmp.eq.s32.totalorder %v1723_v50, %v285_v58 }
  0xdf   : > { %1105 = vmatprep.mubr.msk.bf16.mxu0 %vm1104_vm5, %v1547_v56  ;;  %1153 = vmatprep.mubr.msk.bf16.mxu1 %vm1104_vm5, %v1547_v56  ;;  %vm1110_vm3 = vmpackc.low %vm329_vm15, %vm327_vm0 }
  0xe0   : > { %v294_v59 = vpop.permute.xlu1 %293  ;;  %v291_v60 = vpop.permute.xlu0 %290 }
  0xe1   : > { %vm334_vm1 = vcmp.eq.s32.totalorder %v1726_v53, %v294_v59  ;;  %vm332_vm2 = vcmp.eq.s32.totalorder %v1726_v53, %v291_v60  ;;  %vm333_vm5 = vcmp.eq.s32.totalorder %v1723_v50, %v294_v59  ;;  %vm331_vm6 = vcmp.eq.s32.totalorder %v1723_v50, %v291_v60 }
  0xe2   : > { %vm1112_vm4 = vmpackc.low %vm334_vm1, %vm332_vm2 }
  0xe3   : > { %vm1114_vm9 = vmpackc.low %vm333_vm5, %vm331_vm6 }
  0xe4   : > { %v300_v61 = vpop.permute.xlu1 %299  ;;  %v297_v62 = vpop.permute.xlu0 %296 }
  0xe5   : > { %vm338_vm7 = vcmp.eq.s32.totalorder %v1726_v53, %v300_v61  ;;  %vm336_vm8 = vcmp.eq.s32.totalorder %v1726_v53, %v297_v62  ;;  %vm337_vm11 = vcmp.eq.s32.totalorder %v1723_v50, %v300_v61  ;;  %vm335_vm12 = vcmp.eq.s32.totalorder %v1723_v50, %v297_v62 }
  0xe6   : > { %1107 = vmatmul.mubr.msk.bf16.gmra.mrb[4].mxu0 %vm1106_vm13, %v1547_v56  ;;  %1155 = vmatmul.mubr.msk.bf16.gmra.mrb[4].mxu1 %vm1106_vm13, %v1547_v56  ;;  %vm1116_vm10 = vmpackc.low %vm338_vm7, %vm336_vm8 }
  0xe7   : > { %1109 = vmatprep.mubr.msk.bf16.mxu0 %vm1108_vm14, %v1547_v56  ;;  %1157 = vmatprep.mubr.msk.bf16.mxu1 %vm1108_vm14, %v1547_v56  ;;  %vm1118_vm15 = vmpackc.low %vm337_vm11, %vm335_vm12 }
  0xe8   : > { %v306_v63 = vpop.permute.xlu1 %305  ;;  %v303_v0 = vpop.permute.xlu0 %302 }
  0xe9   : > { %vm342_vm13 = vcmp.eq.s32.totalorder %v1726_v53, %v306_v63  ;;  %vm340_vm14 = vcmp.eq.s32.totalorder %v1726_v53, %v303_v0  ;;  %vm341_vm1 = vcmp.eq.s32.totalorder %v1723_v50, %v306_v63  ;;  %vm339_vm2 = vcmp.eq.s32.totalorder %v1723_v50, %v303_v0 }
  0xea   : > { %vm1120_vm0 = vmpackc.low %vm342_vm13, %vm340_vm14 }
  0xeb   : > { %vm1122_vm5 = vmpackc.low %vm341_vm1, %vm339_vm2 }
  0xec   : > { %v312_v1 = vpop.permute.xlu1 %311  ;;  %v309_v2 = vpop.permute.xlu0 %308 }
  0xed   : > { %vm345_vm7 = vcmp.eq.s32.totalorder %v1723_v50, %v312_v1  ;;  %vm343_vm8 = vcmp.eq.s32.totalorder %v1723_v50, %v309_v2 }
  0xee   : > { %1111 = vmatmul.mubr.msk.bf16.gmra.mrb[8].mxu0 %vm1110_vm3, %v1547_v56  ;;  %1159 = vmatmul.mubr.msk.bf16.gmra.mrb[8].mxu1 %vm1110_vm3, %v1547_v56  ;;  %vm346_vm3 = vcmp.eq.s32.totalorder %v1726_v53, %v312_v1  ;;  %vm1126_vm11 = vmpackc.low %vm345_vm7, %vm343_vm8 }
  0xef   : > { %1113 = vmatprep.mubr.msk.bf16.mxu0 %vm1112_vm4, %v1547_v56  ;;  %1161 = vmatprep.mubr.msk.bf16.mxu1 %vm1112_vm4, %v1547_v56  ;;  %vm344_vm4 = vcmp.eq.s32.totalorder %v1726_v53, %v309_v2 }
  0xf0   : > { %vm1124_vm6 = vmpackc.low %vm346_vm3, %vm344_vm4  ;;  %v318_v3 = vpop.permute.xlu1 %317  ;;  %v315_v4 = vpop.permute.xlu0 %314 }
  0xf1   : > { %vm349_vm13 = vcmp.eq.s32.totalorder %v1723_v50, %v318_v3  ;;  %vm347_vm14 = vcmp.eq.s32.totalorder %v1723_v50, %v315_v4 }
  0xf6   : > { %1115 = vmatmul.mubr.msk.bf16.gmra.mrb[12].mxu0 %vm1114_vm9, %v1547_v56  ;;  %1163 = vmatmul.mubr.msk.bf16.gmra.mrb[12].mxu1 %vm1114_vm9, %v1547_v56  ;;  %vm350_vm9 = vcmp.eq.s32.totalorder %v1726_v53, %v318_v3  ;;  %v887_v3 = vld [vmem:[%s1798_s7 + $0x30] sm:$0xff] }
  0xf7   : > { %1117 = vmatprep.mubr.msk.bf16.mxu0 %vm1116_vm10, %v1547_v56  ;;  %1165 = vmatprep.mubr.msk.bf16.mxu1 %vm1116_vm10, %v1547_v56  ;;  %vm348_vm10 = vcmp.eq.s32.totalorder %v1726_v53, %v315_v4 }
  0xf8   : > { %vm1128_vm12 = vmpackc.low %vm350_vm9, %vm348_vm10 }
  0xfe   : > { %1119 = vmatmul.mubr.msk.bf16.gmra.mrb[16].mxu0 %vm1118_vm15, %v1547_v56  ;;  %1167 = vmatmul.mubr.msk.bf16.gmra.mrb[16].mxu1 %vm1118_vm15, %v1547_v56  ;;  %vm1130_vm15 = vmpackc.low %vm349_vm13, %vm347_vm14 }
  0xff   : > { %1121 = vmatprep.mubr.msk.bf16.mxu0 %vm1120_vm0, %v1547_v56  ;;  %1169 = vmatprep.mubr.msk.bf16.mxu1 %vm1120_vm0, %v1547_v56 }
 0x106   : > { %1123 = vmatmul.mubr.msk.bf16.gmra.mrb[20].mxu0 %vm1122_vm5, %v1547_v56  ;;  %1171 = vmatmul.mubr.msk.bf16.gmra.mrb[20].mxu1 %vm1122_vm5, %v1547_v56 }
 0x107   : > { %1125 = vmatprep.mubr.msk.bf16.mxu0 %vm1124_vm6, %v1547_v56  ;;  %1173 = vmatprep.mubr.msk.bf16.mxu1 %vm1124_vm6, %v1547_v56 }
 0x10e   : > { %1127 = vmatmul.mubr.msk.bf16.gmra.mrb[24].mxu0 %vm1126_vm11, %v1547_v56  ;;  %1175 = vmatmul.mubr.msk.bf16.gmra.mrb[24].mxu1 %vm1126_vm11, %v1547_v56 }
 0x10f   : > { %1129 = vmatprep.mubr.msk.bf16.mxu0 %vm1128_vm12, %v1547_v56  ;;  %1177 = vmatprep.mubr.msk.bf16.mxu1 %vm1128_vm12, %v1547_v56 }
 0x116   : > { %1131 = vmatmul.mubr.msk.bf16.gmra.mrb[28].mxu0 %vm1130_vm15, %v1547_v56  ;;  %1179 = vmatmul.mubr.msk.bf16.gmra.mrb[28].mxu1 %vm1130_vm15, %v1547_v56 }
 0x1b1   : > { %v1202_v5 = vpop.f32.mrb[0].mxu0  ;;  %v1266_v6 = vpop.f32.mrb[0].mxu1 }
 0x1b2   : > { %v1203_v7 = vpop.f32.mrb[1].mxu0  ;;  %v1267_v8 = vpop.f32.mrb[1].mxu1 }
 0x1b3   : > { %v1204_v9 = vadd.f32 %v1203_v7, %v1202_v5  ;;  %v1268_v10 = vadd.f32 %v1267_v8, %v1266_v6  ;;  %v1205_v11 = vpop.f32.mrb[2].mxu0  ;;  %v1269_v12 = vpop.f32.mrb[2].mxu1 }
 0x1b4   : > { %v1206_v14 = vpop.f32.mrb[3].mxu0  ;;  %v1270_v15 = vpop.f32.mrb[3].mxu1 }
 0x1b5   : > { %v819_v16 = vadd.f32 %v1268_v10, %v1204_v9  ;;  %v1207_v17 = vadd.f32 %v1206_v14, %v1205_v11  ;;  %v1271_v18 = vadd.f32 %v1270_v15, %v1269_v12  ;;  %v888_v9 = vld [vmem:[%s1798_s7 + $0x38] sm:$0xff] }
 0x1b7   : > { %v897_v20 = vadd.f32 %v881_v13, %v819_v16  ;;  %v822_v21 = vadd.f32 %v1271_v18, %v1207_v17 }
 0x1b9   : > { %913 = vst [vmem:[%s1804_s9] sm:$0xff] %v897_v20  ;;  %v898_v22 = vadd.f32 %v882_v19, %v822_v21  ;;  %v1208_v23 = vpop.f32.mrb[4].mxu0  ;;  %v1272_v24 = vpop.f32.mrb[4].mxu1  ;;  %v889_v21 = vld [vmem:[%s1798_s7 + $0x40] sm:$0xff] }
 0x1ba   : > { %v1209_v25 = vpop.f32.mrb[5].mxu0  ;;  %v1273_v26 = vpop.f32.mrb[5].mxu1 }
 0x1bb   : > { %914 = vst [vmem:[%s1804_s9 + $0x8] sm:$0xff] %v898_v22  ;;  %v1210_v27 = vadd.f32 %v1209_v25, %v1208_v23  ;;  %v1274_v28 = vadd.f32 %v1273_v26, %v1272_v24  ;;  %v1211_v29 = vpop.f32.mrb[6].mxu0  ;;  %v1275_v30 = vpop.f32.mrb[6].mxu1 }
 0x1bc   : > { %v1212_v32 = vpop.f32.mrb[7].mxu0  ;;  %v1276_v33 = vpop.f32.mrb[7].mxu1 }
 0x1bd   : > { %v827_v34 = vadd.f32 %v1274_v28, %v1210_v27  ;;  %v1213_v35 = vadd.f32 %v1212_v32, %v1211_v29  ;;  %v1277_v36 = vadd.f32 %v1276_v33, %v1275_v30  ;;  %v890_v27 = vld [vmem:[%s1798_s7 + $0x48] sm:$0xff] }
 0x1bf   : > { %v899_v38 = vadd.f32 %v883_v31, %v827_v34  ;;  %v830_v39 = vadd.f32 %v1277_v36, %v1213_v35 }
 0x1c1   : > { %915 = vst [vmem:[%s1804_s9 + $0x10] sm:$0xff] %v899_v38  ;;  %v900_v40 = vadd.f32 %v884_v37, %v830_v39  ;;  %v1214_v41 = vpop.f32.mrb[8].mxu0  ;;  %v1278_v42 = vpop.f32.mrb[8].mxu1  ;;  %v891_v39 = vld [vmem:[%s1798_s7 + $0x50] sm:$0xff] }
 0x1c2   : > { %v1215_v43 = vpop.f32.mrb[9].mxu0  ;;  %v1279_v44 = vpop.f32.mrb[9].mxu1 }
 0x1c3   : > { %916 = vst [vmem:[%s1804_s9 + $0x18] sm:$0xff] %v900_v40  ;;  %v1216_v45 = vadd.f32 %v1215_v43, %v1214_v41  ;;  %v1280_v46 = vadd.f32 %v1279_v44, %v1278_v42  ;;  %v1217_v47 = vpop.f32.mrb[10].mxu0  ;;  %v1281_v48 = vpop.f32.mrb[10].mxu1 }
 0x1c4   : > { %v1218_v50 = vpop.f32.mrb[11].mxu0  ;;  %v1282_v51 = vpop.f32.mrb[11].mxu1 }
 0x1c5   : > { %v835_v52 = vadd.f32 %v1280_v46, %v1216_v45  ;;  %v1219_v53 = vadd.f32 %v1218_v50, %v1217_v47  ;;  %v1283_v54 = vadd.f32 %v1282_v51, %v1281_v48  ;;  %v892_v45 = vld [vmem:[%s1798_s7 + $0x58] sm:$0xff] }
 0x1c7   : > { %v901_v56 = vadd.f32 %v885_v49, %v835_v52  ;;  %v838_v57 = vadd.f32 %v1283_v54, %v1219_v53 }
 0x1c9   : > { %917 = vst [vmem:[%s1804_s9 + $0x20] sm:$0xff] %v901_v56  ;;  %v902_v58 = vadd.f32 %v886_v55, %v838_v57  ;;  %v1220_v59 = vpop.f32.mrb[12].mxu0  ;;  %v1284_v60 = vpop.f32.mrb[12].mxu1  ;;  %v893_v57 = vld [vmem:[%s1798_s7 + $0x60] sm:$0xff] }
 0x1ca   : > { %v1221_v61 = vpop.f32.mrb[13].mxu0  ;;  %v1285_v62 = vpop.f32.mrb[13].mxu1 }
 0x1cb   : > { %918 = vst [vmem:[%s1804_s9 + $0x28] sm:$0xff] %v902_v58  ;;  %v1222_v63 = vadd.f32 %v1221_v61, %v1220_v59  ;;  %v1286_v0 = vadd.f32 %v1285_v62, %v1284_v60  ;;  %v1223_v1 = vpop.f32.mrb[14].mxu0  ;;  %v1287_v2 = vpop.f32.mrb[14].mxu1 }
 0x1cc   : > { %v1224_v4 = vpop.f32.mrb[15].mxu0  ;;  %v1288_v5 = vpop.f32.mrb[15].mxu1 }
 0x1cd   : > { %v843_v6 = vadd.f32 %v1286_v0, %v1222_v63  ;;  %v1225_v7 = vadd.f32 %v1224_v4, %v1223_v1  ;;  %v1289_v8 = vadd.f32 %v1288_v5, %v1287_v2  ;;  %v894_v63 = vld [vmem:[%s1798_s7 + $0x68] sm:$0xff] }
 0x1cf   : > { %v903_v10 = vadd.f32 %v887_v3, %v843_v6  ;;  %v846_v11 = vadd.f32 %v1289_v8, %v1225_v7 }
 0x1d1   : > { %919 = vst [vmem:[%s1804_s9 + $0x30] sm:$0xff] %v903_v10  ;;  %v904_v12 = vadd.f32 %v888_v9, %v846_v11  ;;  %v1226_v13 = vpop.f32.mrb[16].mxu0  ;;  %v1290_v14 = vpop.f32.mrb[16].mxu1  ;;  %v895_v11 = vld [vmem:[%s1798_s7 + $0x70] sm:$0xff] }
 0x1d2   : > { %v1227_v15 = vpop.f32.mrb[17].mxu0  ;;  %v1291_v16 = vpop.f32.mrb[17].mxu1 }
 0x1d3   : > { %920 = vst [vmem:[%s1804_s9 + $0x38] sm:$0xff] %v904_v12  ;;  %v1228_v17 = vadd.f32 %v1227_v15, %v1226_v13  ;;  %v1292_v18 = vadd.f32 %v1291_v16, %v1290_v14  ;;  %v1229_v19 = vpop.f32.mrb[18].mxu0  ;;  %v1293_v20 = vpop.f32.mrb[18].mxu1 }
 0x1d4   : > { %v1230_v22 = vpop.f32.mrb[19].mxu0  ;;  %v1294_v23 = vpop.f32.mrb[19].mxu1 }
 0x1d5   : > { %v851_v24 = vadd.f32 %v1292_v18, %v1228_v17  ;;  %v1231_v25 = vadd.f32 %v1230_v22, %v1229_v19  ;;  %v1295_v26 = vadd.f32 %v1294_v23, %v1293_v20  ;;  %v896_v17 = vld [vmem:[%s1798_s7 + $0x78] sm:$0xff] }
 0x1d7   : > { %v905_v28 = vadd.f32 %v889_v21, %v851_v24  ;;  %v854_v29 = vadd.f32 %v1295_v26, %v1231_v25 }
 0x1d9   : > { %921 = vst [vmem:[%s1804_s9 + $0x40] sm:$0xff] %v905_v28  ;;  %v906_v30 = vadd.f32 %v890_v27, %v854_v29  ;;  %v1232_v31 = vpop.f32.mrb[20].mxu0  ;;  %v1296_v32 = vpop.f32.mrb[20].mxu1 }
 0x1da   : > { %v1233_v33 = vpop.f32.mrb[21].mxu0  ;;  %v1297_v34 = vpop.f32.mrb[21].mxu1 }
 0x1db   : > { %922 = vst [vmem:[%s1804_s9 + $0x48] sm:$0xff] %v906_v30  ;;  %v1234_v35 = vadd.f32 %v1233_v33, %v1232_v31  ;;  %v1298_v36 = vadd.f32 %v1297_v34, %v1296_v32  ;;  %v1235_v37 = vpop.f32.mrb[22].mxu0  ;;  %v1299_v38 = vpop.f32.mrb[22].mxu1 }
 0x1dc   : > { %v1236_v40 = vpop.f32.mrb[23].mxu0  ;;  %v1300_v41 = vpop.f32.mrb[23].mxu1 }
 0x1dd   : > { %v859_v42 = vadd.f32 %v1298_v36, %v1234_v35  ;;  %v1237_v43 = vadd.f32 %v1236_v40, %v1235_v37  ;;  %v1301_v44 = vadd.f32 %v1300_v41, %v1299_v38 }
 0x1df   : > { %v907_v46 = vadd.f32 %v891_v39, %v859_v42  ;;  %v862_v47 = vadd.f32 %v1301_v44, %v1237_v43 }
 0x1e1   : > { %923 = vst [vmem:[%s1804_s9 + $0x50] sm:$0xff] %v907_v46  ;;  %v908_v48 = vadd.f32 %v892_v45, %v862_v47  ;;  %v1238_v49 = vpop.f32.mrb[24].mxu0  ;;  %v1302_v50 = vpop.f32.mrb[24].mxu1 }
 0x1e2   : > { %v1239_v51 = vpop.f32.mrb[25].mxu0  ;;  %v1303_v52 = vpop.f32.mrb[25].mxu1 }
 0x1e3   : > { %924 = vst [vmem:[%s1804_s9 + $0x58] sm:$0xff] %v908_v48  ;;  %v1240_v53 = vadd.f32 %v1239_v51, %v1238_v49  ;;  %v1304_v54 = vadd.f32 %v1303_v52, %v1302_v50  ;;  %v1241_v55 = vpop.f32.mrb[26].mxu0  ;;  %v1305_v56 = vpop.f32.mrb[26].mxu1 }
 0x1e4   : > { %v1242_v58 = vpop.f32.mrb[27].mxu0  ;;  %v1306_v59 = vpop.f32.mrb[27].mxu1 }
 0x1e5   : > { %v867_v60 = vadd.f32 %v1304_v54, %v1240_v53  ;;  %v1243_v61 = vadd.f32 %v1242_v58, %v1241_v55  ;;  %v1307_v62 = vadd.f32 %v1306_v59, %v1305_v56 }
 0x1e7   : > { %v909_v0 = vadd.f32 %v893_v57, %v867_v60  ;;  %v870_v1 = vadd.f32 %v1307_v62, %v1243_v61 }
 0x1e9   : > { %925 = vst [vmem:[%s1804_s9 + $0x60] sm:$0xff] %v909_v0  ;;  %v910_v2 = vadd.f32 %v894_v63, %v870_v1  ;;  %v1244_v3 = vpop.f32.mrb[28].mxu0  ;;  %v1308_v4 = vpop.f32.mrb[28].mxu1 }
 0x1ea   : > { %v1245_v5 = vpop.f32.mrb[29].mxu0  ;;  %v1309_v6 = vpop.f32.mrb[29].mxu1 }
 0x1eb   : > { %926 = vst [vmem:[%s1804_s9 + $0x68] sm:$0xff] %v910_v2  ;;  %v1246_v7 = vadd.f32 %v1245_v5, %v1244_v3  ;;  %v1310_v8 = vadd.f32 %v1309_v6, %v1308_v4  ;;  %v1247_v9 = vpop.f32.mrb[30].mxu0  ;;  %v1311_v10 = vpop.f32.mrb[30].mxu1 }
 0x1ec   : > { %v1248_v12 = vpop.f32.mrb[31].mxu0  ;;  %v1312_v13 = vpop.f32.mrb[31].mxu1 }
 0x1ed   : > { %v875_v14 = vadd.f32 %v1310_v8, %v1246_v7  ;;  %v1249_v15 = vadd.f32 %v1248_v12, %v1247_v9  ;;  %v1313_v16 = vadd.f32 %v1312_v13, %v1311_v10 }
 0x1ef   : > { %v911_v18 = vadd.f32 %v895_v11, %v875_v14  ;;  %v878_v19 = vadd.f32 %v1313_v16, %v1249_v15 }
 0x1f1   : > { %927 = vst [vmem:[%s1804_s9 + $0x70] sm:$0xff] %v911_v18  ;;  %v912_v20 = vadd.f32 %v896_v17, %v878_v19 }
 0x1f3   : > { %928 = vst [vmem:[%s1804_s9 + $0x78] sm:$0xff] %v912_v20 }
 0x1f4   : > { %1483 = shalt.err (!%p1480_p11)
}
 0x1f5   : > { %s1484_s20 = scalar_lea.hbm %s1839_s13, 2048  ;;  %s1488_s28 = scalar_lea.hbm %s1892_s4, 4096 }
 0x1f6   : > { %p1485_p13 = scmp.ne.s32.totalorder %s1839_s13, %s1484_s20  ;;  %p1489_p6 = scmp.lt.u32.totalorder %s1839_s13, %s1892_s4 }
 0x1f7   : > { %p1490_p9 = scmp.lt.u32.totalorder %s1488_s28, %s1484_s20  ;;  %p1492_p10 = scmp.lt.u32.totalorder %s1484_s20, %s1839_s13 }
 0x1f8   : > { %p1486_p5 = pnand %p1485_p13, %p1905_p1 }
 0x1f9   : > { %p1491_p12 = por %p1490_p9, %p1489_p6 }
 0x1fa   : > { %p1487_p0 = pneg %p1486_p5 }
 0x1fb   : > { %p1493_p2 = por %p1492_p10, %p1491_p12 }
 0x1fd   : > { %p1494_p3 = pnand %p1493_p2, %p1487_p0 }
 0x1ff   : > { %1497 = shalt.err (!%p1494_p3)
}
 0x200   : > { %s1549_s8 = smov 128   ;;  %s1550_s9 = smov 8  }
 0x201   : > { %1322 = dma.vmem_to_hbm [thread:$0]  (%p1905_p1), %s1841_s11, 2048, %s1839_s13, %s1847_s14, %s1549_s8, %s1549_s8, %s1550_s9  }
 0x202 PF: > { %p1339_p4 = scmp.ge.s32.totalorder %s1540_s18, 2  ;;  %s958_s10 = sand.u32 1, %s1528_s15  }
 0x203   : > { %p1906_p7 = scmp.ne.s32.totalorder %s1897_s26, 0  ;;  %s959_s12 = scalar_lea.sflag [#allocation4], %s958_s10 }
 0x205   : > { %p1332_p8 = pnand %p1339_p4, %p1906_p7 }
 0x207   : > { %1523 = dma.done.wait (!%p1332_p8), %s959_s12, 2048  }
 0x208   : > { %1525 = vsyncadd (!%p1332_p8), %s959_s12, 4294965248  ;;  %p16_p11 = scmp.ge.s32.totalorder %s1601_s21, 4   ;;  %s1907_s15 = smov %s1532_s16 }
 0x209   : > { %s1908_s16 = smov %s1536_s17  ;;  %s1909_s17 = smov %s1612_s24 }
 0x20a   : > { %s1910_s18 = smov %s1601_s21  ;;  %18 = sbr.rel (!%p16_p11) target bundleno = 5 (0x5), region = 83 }
 0x211   :  { %964 = vsyncpa [#allocation3], 1 }
 0x212   :  { %966 = vsyncpa [#allocation3 + $0x1], 1 }
 0x213   :  { %967 = vsyncpa [#allocation6], 1 }
 0x214   :  { %968 = vsyncpa [#allocation4], 1 }
 0x215   :  { %970 = vsyncpa [#allocation4 + $0x1], 1 }

</bundles_post_ra>
